<compile_context>
chip_gen: v5e
topology: v5e:2x2
jax: 0.10.0
libtpu: 0.0.40
codegen_flags: <defaults>
</compile_context>

<pallas_src>
import functools

import jax
import jax.numpy as jnp
import numpy as np
from jax.experimental import pallas as pl
from jax.experimental.pallas import tpu as pltpu

D_MODEL = 32     # fc1 input / fc2 output width
D_FF = 64        # hidden width
D_PAD = 128      # lane-dense padded width used inside the kernel

# Row layout of the packed parameter slab (all rows are 128 lanes wide):
#   [0          , 32 )  : w1, zero-padded from (32, 64) to (32, 128)
#   [32         , 160)  : w2, zero-padded from (64, 32) to (128, 128)
#   160                 : b1, zero-padded from (64,) to (128,)
#   161                 : b2, zero-padded from (32,) to (128,)
#   [162        , 168)  : zero padding so the slab is a multiple of 8 sublanes
_W1_ROW = 0
_W2_ROW = D_MODEL                # 32
_B1_ROW = D_MODEL + D_PAD        # 160
_B2_ROW = _B1_ROW + 1            # 161
_SLAB_ROWS = D_MODEL + D_PAD + 8  # 168


# ------------------------------- the kernel ----------------------------------
def ffn_kernel(x_ref, p_ref, o_ref):
    x = x_ref[...]                                    # (N, 32)
    w1 = p_ref[_W1_ROW:_W1_ROW + D_MODEL, :]          # (32, 128)   static slice
    w2 = p_ref[_W2_ROW:_W2_ROW + D_PAD, :]            # (128, 128)  static slice
    b1 = p_ref[_B1_ROW:_B1_ROW + 1, :]                # (1, 128)    sublane row
    b2 = p_ref[_B2_ROW:_B2_ROW + 1, :]                # (1, 128)    sublane row

    # relu(x @ w1 + b1): padded hidden lanes [64:128] stay exactly 0.
    h = jnp.maximum(
        jnp.dot(x, w1, preferred_element_type=jnp.float32) + b1, 0.0)
    # h @ w2 + b2: padded output lanes [32:128] stay exactly 0; full-vreg store.
    o_ref[...] = (
        jnp.dot(h, w2, preferred_element_type=jnp.float32) + b2
    ).astype(o_ref.dtype)


# ---------------------- one-time parameter packing ---------------------------
def pack_params(fc1_w, fc1_b, fc2_w, fc2_b):
    """Pack FFN params into a single lane-dense (168, 128) f32 slab.

    fc1_w: (D_MODEL, D_FF)  [in, out] layout (transpose of torch nn.Linear)
    fc1_b: (D_FF,) or (1, D_FF)
    fc2_w: (D_FF, D_MODEL)
    fc2_b: (D_MODEL,) or (1, D_MODEL)

    Called ONCE at init -- never in the per-call hot path.
    """
    fc1_b = jnp.reshape(fc1_b, (-1,))
    fc2_b = jnp.reshape(fc2_b, (-1,))
    assert fc1_w.shape == (D_MODEL, D_FF)
    assert fc2_w.shape == (D_FF, D_MODEL)
    assert fc1_b.shape == (D_FF,) and fc2_b.shape == (D_MODEL,)

    slab = jnp.zeros((_SLAB_ROWS, D_PAD), jnp.float32)
    slab = slab.at[_W1_ROW:_W1_ROW + D_MODEL, :D_FF].set(fc1_w)
    slab = slab.at[_W2_ROW:_W2_ROW + D_FF, :D_MODEL].set(fc2_w)
    slab = slab.at[_B1_ROW, :D_FF].set(fc1_b)
    slab = slab.at[_B2_ROW, :D_MODEL].set(fc2_b)
    return slab


# -------------------------------- wrapper -------------------------------------
@functools.partial(jax.jit, static_argnames=())
def position_wise_feed_forward(x, param_slab):
    """x: (..., D_MODEL), param_slab from pack_params().  Returns (..., D_MODEL)."""
    orig_shape = x.shape
    assert orig_shape[-1] == D_MODEL
    n = int(np.prod(orig_shape[:-1]))
    x2d = x.reshape(n, D_MODEL)

    # Sublane-align the row count (no-op for the demo's n=16).
    n_pad = ((n + 7) // 8) * 8
    if n_pad != n:
        x2d = jnp.pad(x2d, ((0, n_pad - n), (0, 0)))

    # No grid: the whole problem (<100 KB) runs in one invocation with all
    # operands resident in VMEM.  TODO(synk): add a parallel row grid
    # (256-row blocks) once the caller batches >=256 rows, so v7x uses both TCs.
    out = pl.pallas_call(
        ffn_kernel,
        out_shape=jax.ShapeDtypeStruct((n_pad, D_PAD), x.dtype),
        in_specs=[pl.BlockSpec(memory_space=pltpu.MemorySpace.VMEM)] * 2,
        out_specs=pl.BlockSpec(memory_space=pltpu.MemorySpace.VMEM),
    )(x2d, param_slab)

    return out[:n, :D_MODEL].reshape(orig_shape)


# ----------------------- deterministic parameter init -------------------------
def init_params(key):
    k1, k2, k3, k4 = jax.random.split(key, 4)
    fc1_w = jax.random.normal(k1, (D_MODEL, D_FF), jnp.float32) * 0.05
    fc1_b = jax.random.normal(k2, (D_FF,), jnp.float32) * 0.05
    fc2_w = jax.random.normal(k3, (D_FF, D_MODEL), jnp.float32) * 0.05
    fc2_b = jax.random.normal(k4, (D_MODEL,), jnp.float32) * 0.05
    return fc1_w, fc1_b, fc2_w, fc2_b


# ----------------------------- pure-JAX reference ------------------------------
def reference(x, fc1_w, fc1_b, fc2_w, fc2_b):
    h = jnp.maximum(x @ fc1_w + fc1_b, 0.0)
    return h @ fc2_w + fc2_b


if __name__ == "__main__":
    key = jax.random.PRNGKey(0)
    kx, kp = jax.random.split(key)
    B, S = 2, 8
    x = jax.random.normal(kx, (B, S, D_MODEL), jnp.float32)
    fc1_w, fc1_b, fc2_w, fc2_b = init_params(kp)

    # One-time packing (init-time, not per call).
    param_slab = pack_params(fc1_w, fc1_b, fc2_w, fc2_b)

    out = position_wise_feed_forward(x, param_slab)
    jax.block_until_ready(out)

    ref = reference(x, fc1_w, fc1_b, fc2_w, fc2_b)
    assert out.shape == (B, S, D_MODEL)
    assert np.allclose(np.asarray(out), np.asarray(ref), rtol=1e-3, atol=1e-3), (
        "mismatch vs pure-JAX reference")
    print("KERNEL_OK")
</pallas_src>

<mosaic_0001>
module attributes {stable_mosaic.version = 11 : i64} {
  func.func @ffn_kernel(%arg0: memref<16x32xf32, #tpu.memory_space<vmem>>, %arg1: memref<168x128xf32, #tpu.memory_space<vmem>>, %arg2: memref<16x128xf32, #tpu.memory_space<vmem>>) attributes {dimension_semantics = [], scalar_prefetch = 0 : i64, scratch_operands = 0 : i64, tpu.core_type = #tpu.core_type<tc>} {
    %c0 = arith.constant 0 : index
    %c0_0 = arith.constant 0 : index
    %0 = vector.load %arg0[%c0, %c0_0] : memref<16x32xf32, #tpu.memory_space<vmem>>, vector<16x32xf32>
    %c0_1 = arith.constant 0 : index
    %c0_2 = arith.constant 0 : index
    %1 = vector.load %arg1[%c0_1, %c0_2] : memref<168x128xf32, #tpu.memory_space<vmem>>, vector<32x128xf32>
    %c32 = arith.constant 32 : index
    %c0_3 = arith.constant 0 : index
    %2 = vector.load %arg1[%c32, %c0_3] : memref<168x128xf32, #tpu.memory_space<vmem>>, vector<128x128xf32>
    %c160 = arith.constant 160 : index
    %c0_4 = arith.constant 0 : index
    %3 = vector.load %arg1[%c160, %c0_4] : memref<168x128xf32, #tpu.memory_space<vmem>>, vector<1x128xf32>
    %c161 = arith.constant 161 : index
    %c0_5 = arith.constant 0 : index
    %4 = vector.load %arg1[%c161, %c0_5] : memref<168x128xf32, #tpu.memory_space<vmem>>, vector<1x128xf32>
    %cst = arith.constant dense<0.000000e+00> : vector<16x128xf32>
    %5 = tpu.matmul %0, %1, %cst {dimension_numbers = #tpu.dot_dimension_numbers<[1], [0], [0], [1], [0, 0, 1, 1], [], []>} : vector<16x32xf32>, vector<32x128xf32>, vector<16x128xf32> -> vector<16x128xf32>
    %6 = vector.broadcast %3 : vector<1x128xf32> to vector<16x128xf32>
    %7 = arith.addf %5, %6 : vector<16x128xf32>
    %cst_6 = arith.constant 0.000000e+00 : f32
    %8 = vector.broadcast %cst_6 : f32 to vector<16x128xf32>
    %9 = arith.maximumf %7, %8 : vector<16x128xf32>
    %cst_7 = arith.constant dense<0.000000e+00> : vector<16x128xf32>
    %10 = tpu.matmul %9, %2, %cst_7 {dimension_numbers = #tpu.dot_dimension_numbers<[1], [0], [0], [1], [0, 0, 1, 1], [], []>} : vector<16x128xf32>, vector<128x128xf32>, vector<16x128xf32> -> vector<16x128xf32>
    %11 = vector.broadcast %4 : vector<1x128xf32> to vector<16x128xf32>
    %12 = arith.addf %10, %11 : vector<16x128xf32>
    %c0_8 = arith.constant 0 : index
    %c0_9 = arith.constant 0 : index
    %13 = vector.load %arg2[%c0_8, %c0_9] : memref<16x128xf32, #tpu.memory_space<vmem>>, vector<16x128xf32>
    tpu.vector_store %arg2[%c0_8, %c0_9], %12 {strides = array<i32>} : memref<16x128xf32, #tpu.memory_space<vmem>>, vector<16x128xf32>,
    return
  }
}

</mosaic_0001>

<bundles_post_ra>
// kernel: position_wise_feed_forward.1
= control target key start
LH: loop header
LB: loop body
LE: loop exit
PB: predicated region body
PF: predicated region fallthrough
CT: control target
= control target key end

     0   :  { %7 = vsyncpa [#allocation3], 0  ;;  %s241_s0 = inlined_call_operand.hbm [shape: f32[16,32], index: 0, kind: input, shape index: {}]   ;;  %s242_s1 = inlined_call_operand.hbm [shape: f32[168,128], index: 1, kind: input, shape index: {}]   ;;  %s243_s2 = inlined_call_operand.vmem [shape: f32[16,128], index: 2, kind: output, shape index: {}]  }
   0x1   :  { %s13_s11 = sshll.u32 %s241_s0, 4  ;;  %s14_s11 = int_to_ptr.hbm [resolvable:$true] %s13_s11 }
   0x2   :  { %8 = vsyncpa [#allocation5], 0  ;;  %s208_s12 = smov [#allocation2]   ;;  %s26_s16 = sshll.u32 %s242_s1, 4  ;;  %s27_s16 = int_to_ptr.hbm [resolvable:$true] %s26_s16 }
   0x3   :  { %s15_s13 = sshll.u32 %s208_s12, 4  ;;  %s209_s17 = smov 128   ;;  %s16_s13 = int_to_ptr.vmem [resolvable:$true] %s15_s13 }
   0x4   :  { %s210_s18 = smov 8   ;;  %s211_s19 = smov [#allocation4]  }
   0x5   :  { %21 = dma.hbm_to_vmem [thread:$0]  %s14_s11, 256, %s16_s13, [#allocation3], %s209_s17, %s209_s17, %s210_s18  }
   0x6   :  { %s28_s20 = sshll.u32 %s211_s19, 4  ;;  %s29_s20 = int_to_ptr.vmem [resolvable:$true] %s28_s20 }
   0x7   :  { %34 = dma.hbm_to_vmem [thread:$0]  %s27_s16, 2688, %s29_s20, [#allocation5], %s209_s17, %s209_s17, %s210_s18  }
   0x8   :  { %204 = dma.done.wait [#allocation3], 256  }
   0x9   :  { %205 = vsyncadd [#allocation3], 4294967040 }
   0xa   :  { %206 = dma.done.wait [#allocation5], 2688  }
   0xb   :  { %207 = vsyncadd [#allocation5], 4294964608  ;;  %v48_v0 = vld [vmem:[#allocation4 + $0x18] sm:$0xff]  ;;  %v47_v1 = vld [vmem:[#allocation4 + $0x10] sm:$0xff]  ;;  %vm68_vm0 = vcmask 261120  }
   0xc   :  { %87 = vmatpush.msra.mxu0 %v48_v0  ;;  %v46_v2 = vld [vmem:[#allocation4 + $0x8] sm:$0xff]  ;;  %v64_v3 = vld [vmem:[#allocation4 + $0x98] sm:$0xff]  ;;  %v63_v4 = vld [vmem:[#allocation4 + $0x90] sm:$0xff] }
   0xd   :  { %101 = vmatpush.msra.mxu1 %v64_v3  ;;  %v45_v5 = vld [vmem:[#allocation4] sm:$0xff]  ;;  %v62_v6 = vld [vmem:[#allocation4 + $0x88] sm:$0xff]  ;;  %134 = vmatpush.msra.mxu2 %v64_v3  ;;  %v43_v7 = vld [vmem:[#allocation2] sm:$0xff] }
   0xe   :  { %88 = vmatpush.msra.mxu0 %v47_v1  ;;  %v61_v8 = vld [vmem:[#allocation4 + $0x80] sm:$0xff]  ;;  %v60_v9 = vld [vmem:[#allocation4 + $0x78] sm:$0xff]  ;;  %v59_v10 = vld [vmem:[#allocation4 + $0x70] sm:$0xff] }
   0xf   :  { %102 = vmatpush.msra.mxu1 %v63_v4  ;;  %135 = vmatpush.msra.mxu2 %v63_v4  ;;  %v58_v11 = vld [vmem:[#allocation4 + $0x68] sm:$0xff]  ;;  %v44_v12 = vld [vmem:[#allocation2 + $0x8] sm:$0xff]  ;;  %v57_v13 = vld [vmem:[#allocation4 + $0x60] sm:$0xff] }
  0x10   :  { %89 = vmatpush.msra.mxu0 %v46_v2  ;;  %v56_v14 = vld [vmem:[#allocation4 + $0x58] sm:$0xff]  ;;  %v55_v15 = vld [vmem:[#allocation4 + $0x50] sm:$0xff]  ;;  %v54_v16 = vld [vmem:[#allocation4 + $0x48] sm:$0xff] }
  0x11   :  { %103 = vmatpush.msra.mxu1 %v62_v6  ;;  %136 = vmatpush.msra.mxu2 %v62_v6  ;;  %v53_v17 = vld [vmem:[#allocation4 + $0x40] sm:$0xff]  ;;  %v52_v18 = vld [vmem:[#allocation4 + $0x38] sm:$0xff]  ;;  %v51_v19 = vld [vmem:[#allocation4 + $0x30] sm:$0xff] }
  0x12   :  { %90 = vmatpush.msra.mxu0 %v45_v5  ;;  %v50_v20 = vld [vmem:[#allocation4 + $0x28] sm:$0xff]  ;;  %v49_v21 = vld [vmem:[#allocation4 + $0x20] sm:$0xff] }
  0x13   :  { %132 = vmatmul.msk.f32.vlgmr.msra.gmra.mxu0 %vm68_vm0, %v43_v7  ;;  %104 = vmatpush.msra.mxu1 %v61_v8  ;;  %v154_v22 = vld [vmem:[#allocation4 + $0xa0] ss:$0 sm:$0xff]  ;;  %v155_v29 = vld [vmem:[#allocation4 + $0xa1] ss:$0 sm:$0xff] }
  0x14   :  { %137 = vmatpush.msra.mxu2 %v61_v8 }
  0x15   :  { %105 = vmatpush.msra.mxu1 %v60_v9 }
  0x16   :  { %138 = vmatpush.msra.mxu2 %v60_v9 }
  0x17   :  { %106 = vmatpush.msra.mxu1 %v59_v10 }
  0x18   :  { %139 = vmatpush.msra.mxu2 %v59_v10 }
  0x19   :  { %107 = vmatpush.msra.mxu1 %v58_v11 }
  0x1a   :  { %140 = vmatpush.msra.mxu2 %v58_v11 }
  0x1b   :  { %133 = vmatmul.msk.f32.gmra.mxu0 %vm68_vm0, %v44_v12  ;;  %108 = vmatpush.msra.mxu1 %v57_v13 }
  0x1c   :  { %141 = vmatpush.msra.mxu2 %v57_v13 }
  0x1d   :  { %109 = vmatpush.msra.mxu1 %v56_v14 }
  0x1e   :  { %142 = vmatpush.msra.mxu2 %v56_v14 }
  0x1f   :  { %110 = vmatpush.msra.mxu1 %v55_v15 }
  0x20   :  { %143 = vmatpush.msra.mxu2 %v55_v15 }
  0x21   :  { %111 = vmatpush.msra.mxu1 %v54_v16 }
  0x22   :  { %144 = vmatpush.msra.mxu2 %v54_v16 }
  0x23   :  { %112 = vmatpush.msra.mxu1 %v53_v17 }
  0x24   :  { %145 = vmatpush.msra.mxu2 %v53_v17 }
  0x25   :  { %113 = vmatpush.msra.mxu1 %v52_v18 }
  0x26   :  { %146 = vmatpush.msra.mxu2 %v52_v18 }
  0x27   :  { %114 = vmatpush.msra.mxu1 %v51_v19 }
  0x28   :  { %147 = vmatpush.msra.mxu2 %v51_v19 }
  0x29   :  { %115 = vmatpush.msra.mxu1 %v50_v20 }
  0x2a   :  { %148 = vmatpush.msra.mxu2 %v50_v20 }
  0x2b   :  { %116 = vmatpush.msra.mxu1 %v49_v21 }
  0x2c   :  { %149 = vmatpush.msra.mxu2 %v49_v21 }
  0x90   :  { %v92_v23 = vpop.f32.mrf.mxu0 }
  0x91   :  { %v93_v24 = vadd.f32 %v154_v22, %v92_v23 }
  0x93   :  { %v98_v25 = vmax.f32 %v93_v24, 0.0 }
  0x95   :  { %117 = vmatmul.f32.vlgmr.msra.gmra.mxu1 %v98_v25 }
  0x98   :  { %v95_v26 = vpop.f32.mrf.mxu0 }
  0x99   :  { %v96_v27 = vadd.f32 %v154_v22, %v95_v26 }
  0x9b   :  { %v99_v28 = vmax.f32 %v96_v27, 0.0 }
  0x9d   :  { %120 = vmatmul.f32.vlgmr.msra.gmra.mxu2 %v99_v28 }
 0x112   :  { %v118_v30 = vpop.f32.mrf.mxu1 }
 0x113   :  { %v119_v31 = vadd.f32 %v155_v29, %v118_v30 }
 0x115   :  { %124 = vst [vmem:[%s243_s2] sm:$0xff] %v119_v31 }
 0x120   :  { %v121_v32 = vpop.f32.mrf.mxu2 }
 0x121   :  { %v122_v33 = vadd.f32 %v155_v29, %v121_v32 }
 0x123   :  { %125 = vst [vmem:[%s243_s2 + $0x8] sm:$0xff] %v122_v33 }
 0x124   :  { %130 = vsyncpa [#allocation3], 1 }
 0x125   :  { %131 = vsyncpa [#allocation5], 1 }

</bundles_post_ra>
